<compile_context>
chip_gen: v7x
topology: tpu7x:2x2x1
jax: 0.10.0
libtpu: 0.0.40
codegen_flags: <defaults>
</compile_context>

<pallas_src>
import jax
import jax.numpy as jnp
import numpy as np
from jax import lax
from jax.experimental import pallas as pl
from jax.experimental.pallas import tpu as pltpu


_VMEM = pl.BlockSpec(memory_space=pltpu.MemorySpace.VMEM)
_KSIZE = 4
_EPS = 1e-5
_LEAK = 0.2


# --------------------------- Static layer geometry -------------------------- #

def _layer_configs(input_channel, output_channel, hidden_dims, height, width):
    cfgs = []
    cin, h, w = input_channel, height, width
    for i, cout in enumerate(hidden_dims):
        oh = (h + 2 - _KSIZE) // 2 + 1
        ow = (w + 2 - _KSIZE) // 2 + 1
        cfgs.append(dict(cin=cin, cout=cout, h=h, w=w, oh=oh, ow=ow,
                         stride=2, pad=1, bn=(i > 0), act="leaky"))
        cin, h, w = cout, oh, ow
    oh, ow = h - _KSIZE + 1, w - _KSIZE + 1
    cfgs.append(dict(cin=cin, cout=output_channel, h=h, w=w, oh=oh, ow=ow,
                     stride=1, pad=0, bn=False, act="sigmoid"))
    return cfgs


def _round_up(x, m):
    return ((x + m - 1) // m) * m


def _lane_width(cfgs):
    widths = []
    for c in cfgs:
        widths.append(c["w"] * c["cin"])
        widths.append(c["ow"] * c["cout"])
    return _round_up(max(widths), 128)


# ------------------------------ Fused kernel -------------------------------- #

def _build_kernel(cfgs, n_batch, n_inputs):
    """Generate the fused forward kernel body for a static layer configuration."""

    def kernel(*refs):
        out_ref = refs[n_inputs]
        pad_ref = refs[n_inputs + 1]                    # shared zero-padded staging scratch
        m = refs[0][...].astype(jnp.float32)            # (N*H0, LANE), pad lanes are zero
        idx = 1
        for cfg in cfgs:
            h, oh, stride, p = cfg["h"], cfg["oh"], cfg["stride"], cfg["pad"]
            blk = h + 2 * p

            # Stage the layer input into the zero-padded scratch; the zero rows around
            # each batch block implement the conv's spatial padding (pad=1) for free.
            pad_ref[...] = jnp.zeros(pad_ref.shape, pad_ref.dtype)
            for n in range(n_batch):
                pad_ref[pl.ds(n * blk + p, h), :] = m[n * h:(n + 1) * h, :]

            # Strided row gather per kh tap (no dense one-hot matmul), lane-concat into
            # T (N*OH, 4*LANE), then ONE bf16 MXU matmul against the kh-stacked,
            # weight-folded B matrix.
            parts = []
            for kh in range(_KSIZE):
                pieces = []
                for n in range(n_batch):
                    start = n * blk + kh
                    rowsel = pl.ds(start, oh, stride=stride) if stride > 1 else pl.ds(start, oh)
                    pieces.append(pad_ref[rowsel, :])
                parts.append(pieces[0] if n_batch == 1 else jnp.concatenate(pieces, axis=0))
            t = jnp.concatenate(parts, axis=1).astype(jnp.bfloat16)      # (N*OH, 4*LANE)
            acc = jnp.dot(t, refs[idx][...], preferred_element_type=jnp.float32)
            idx += 1

            if cfg["bn"]:
                r_ref, e_ref, g_ref, b_ref = refs[idx], refs[idx + 1], refs[idx + 2], refs[idx + 3]
                idx += 4
                inv_rows = 1.0 / float(n_batch * oh)
                # Per-channel batch stats (training-mode, biased var): sublane row-sum,
                # then thin reduce (LANE x C) / broadcast (C x LANE) matmuls in f32.
                col_sum = jnp.sum(acc, axis=0, keepdims=True)                           # (1, LANE)
                ch_mean = jnp.dot(col_sum, r_ref[...],
                                  preferred_element_type=jnp.float32) * inv_rows        # (1, C)
                mean_full = jnp.dot(ch_mean, e_ref[...],
                                    preferred_element_type=jnp.float32)                 # (1, LANE)
                cent = acc - mean_full
                col_sq = jnp.sum(cent * cent, axis=0, keepdims=True)
                ch_var = jnp.dot(col_sq, r_ref[...],
                                 preferred_element_type=jnp.float32) * inv_rows
                var_full = jnp.dot(ch_var, e_ref[...],
                                   preferred_element_type=jnp.float32)
                acc = cent * lax.rsqrt(var_full + _EPS) * g_ref[...] + b_ref[...]

            if cfg["act"] == "leaky":
                acc = jnp.maximum(acc, _LEAK * acc)
            else:  # sigmoid: exp on EUP, approximate reciprocal keeps the divide off VALU
                acc = pl.reciprocal(1.0 + jnp.exp(-acc), approx=True)
            m = acc
        out_ref[...] = m.astype(out_ref.dtype)

    return kernel


# ----------------------- One-time parameter preparation --------------------- #

def _build_bstack(wgt, cfg, lane):
    """Fold conv weights + kw gather/pad/stride into a single kh-stacked matmul operand.

    Rows:  kh*LANE + w*Cin + c   (matches the lane-concat of the 4 row-gathered taps)
    Cols:  ow*Cout + oc          (output lane layout); pad rows/cols are zero.
    """
    wnp = np.asarray(wgt, np.float32)                   # (OC, Cin, KH, KW)
    cin, cout, ow, w_in = cfg["cin"], cfg["cout"], cfg["ow"], cfg["w"]
    b = np.zeros((_KSIZE * lane, lane), np.float32)
    for kh in range(_KSIZE):
        for kw in range(_KSIZE):
            for o in range(ow):
                src = cfg["stride"] * o + kw - cfg["pad"]
                if 0 <= src < w_in:
                    rows = kh * lane + src * cin + np.arange(cin)
                    cols = o * cout + np.arange(cout)
                    b[np.ix_(rows, cols)] += wnp[:, :, kh, kw].T     # (Cin, OC)
    return jnp.asarray(b, jnp.bfloat16)


def _build_bn_operands(gamma, beta, cfg, lane):
    c, ow = cfg["cout"], cfg["ow"]
    r = np.zeros((lane, c), np.float32)                 # sum over OW per channel, / OW folded in
    e = np.zeros((c, lane), np.float32)                 # broadcast channel value back to OW*C cols
    for w in range(ow):
        for ch in range(c):
            r[w * c + ch, ch] = 1.0 / ow
            e[ch, w * c + ch] = 1.0
    g = np.zeros((1, lane), np.float32)
    bt = np.zeros((1, lane), np.float32)
    g[0, : ow * c] = np.tile(np.asarray(gamma, np.float32), ow)
    bt[0, : ow * c] = np.tile(np.asarray(beta, np.float32), ow)
    return (jnp.asarray(r), jnp.asarray(e), jnp.asarray(g), jnp.asarray(bt))


def prepare_params(params, cfgs, lane):
    ops = []
    bn_idx = 0
    for cfg, wgt in zip(cfgs, params["convs"]):
        entry = [_build_bstack(wgt, cfg, lane)]
        if cfg["bn"]:
            gamma, beta = params["bn"][bn_idx]
            bn_idx += 1
            entry.extend(_build_bn_operands(gamma, beta, cfg, lane))
        ops.append(entry)
    return ops


# ------------------------------- Forward pass ------------------------------- #

def discriminator_cnn_f_forward(prepared_ops, cfgs, n_batch, lane, x, y):
    h, w, cin = cfgs[0]["h"], cfgs[0]["w"], cfgs[0]["cin"]
    xy = jnp.concatenate([x, y], axis=1)                                   # (N, Cin, H, W)
    act0 = jnp.transpose(xy, (0, 2, 3, 1)).reshape(n_batch * h, w * cin)   # channels-last 2D
    act0 = jnp.pad(act0, ((0, 0), (0, lane - w * cin)))                    # lane-dense (128-mult)

    inputs = [act0]
    for entry in prepared_ops:
        inputs.extend(entry)
    n_inputs = len(inputs)

    last = cfgs[-1]
    scratch_rows = _round_up(max(n_batch * (c["h"] + 2 * c["pad"]) for c in cfgs), 8)

    out = pl.pallas_call(
        _build_kernel(cfgs, n_batch, n_inputs),
        out_shape=jax.ShapeDtypeStruct((n_batch * last["oh"], lane), jnp.float32),
        in_specs=[_VMEM] * n_inputs,
        out_specs=_VMEM,
        scratch_shapes=[pltpu.VMEM((scratch_rows, lane), jnp.float32)],
        compiler_params=pltpu.CompilerParams(vmem_limit_bytes=32 * 1024 * 1024),
    )(*inputs)

    real = out[:, : last["ow"] * last["cout"]]
    if last["oh"] == 1 and last["ow"] == 1:
        return real                                       # already the flattened (N, OC) view
    real = real.reshape(n_batch, last["oh"], last["ow"], last["cout"])
    return real.transpose(0, 3, 1, 2).reshape(n_batch, -1)  # match torch view(N, -1) order


# ------------------------------ Initialization ------------------------------ #

def init_params(key, input_channel, output_channel, hidden_dims):
    params = {"convs": [], "bn": []}
    prev = input_channel
    for i, d in enumerate(hidden_dims):
        key, sub = jax.random.split(key)
        params["convs"].append(0.05 * jax.random.normal(sub, (d, prev, 4, 4), jnp.float32))
        if i > 0:
            params["bn"].append((jnp.ones((d,), jnp.float32), jnp.zeros((d,), jnp.float32)))
        prev = d
    key, sub = jax.random.split(key)
    params["convs"].append(
        0.05 * jax.random.normal(sub, (output_channel, prev, 4, 4), jnp.float32))
    return params


# -------------------------------- Reference --------------------------------- #

def _reference_forward(params, x, y):
    """Pure-JAX reference (lax.conv, f32 HIGHEST precision) with identical semantics."""
    out = jnp.concatenate([x, y], axis=1)

    def conv(o, w, s, p):
        return lax.conv_general_dilated(o, w, (s, s), [(p, p), (p, p)],
                                        dimension_numbers=("NCHW", "OIHW", "NCHW"),
                                        precision=lax.Precision.HIGHEST)

    out = conv(out, params["convs"][0], 2, 1)
    out = jnp.where(out >= 0, out, 0.2 * out)
    for i, w in enumerate(params["convs"][1:-1]):
        out = conv(out, w, 2, 1)
        mean = jnp.mean(out, axis=(0, 2, 3), keepdims=True)
        var = jnp.mean((out - mean) ** 2, axis=(0, 2, 3), keepdims=True)
        g, b = params["bn"][i]
        out = (out - mean) * lax.rsqrt(var + 1e-5) * g[None, :, None, None] + b[None, :, None, None]
        out = jnp.where(out >= 0, out, 0.2 * out)
    out = conv(out, params["convs"][-1], 1, 0)
    out = jax.nn.sigmoid(out)
    return out.reshape(out.shape[0], -1)


# ----------------------------------- Main ------------------------------------ #

if __name__ == "__main__":
    key = jax.random.PRNGKey(0)
    kx, ky, kp = jax.random.split(key, 3)

    # x, y each contribute 2 channels; concatenated input_channel = 4.
    batch, cx, cy, hw = 2, 2, 2, 16
    hidden_dims = [8, 16]
    output_channel = 1
    input_channel = cx + cy

    x = jax.random.normal(kx, (batch, cx, hw, hw), jnp.float32)
    y = jax.random.normal(ky, (batch, cy, hw, hw), jnp.float32)
    params = init_params(kp, input_channel, output_channel, hidden_dims)

    cfgs = _layer_configs(input_channel, output_channel, hidden_dims, hw, hw)
    lane = _lane_width(cfgs)                       # 128-multiple lane width for all layers
    prepared = prepare_params(params, cfgs, lane)  # one-time weight folding (off the hot path)

    fwd = jax.jit(lambda ops, a, b: discriminator_cnn_f_forward(ops, cfgs, batch, lane, a, b))
    out = jax.block_until_ready(fwd(prepared, x, y))

    ref = jax.block_until_ready(_reference_forward(params, x, y))
    # bf16 MXU operands + approximate-reciprocal sigmoid -> relaxed tolerance vs f32 reference.
    np.testing.assert_allclose(np.asarray(out), np.asarray(ref), rtol=5e-2, atol=2e-2)
    assert out.shape == (batch, output_channel)

    print("KERNEL_OK")
</pallas_src>

<mosaic_0001>
module attributes {stable_mosaic.version = 11 : i64} {
  func.func @kernel(%arg0: memref<32x128xf32, #tpu.memory_space<vmem>>, %arg1: memref<512x128xbf16, #tpu.memory_space<vmem>>, %arg2: memref<512x128xbf16, #tpu.memory_space<vmem>>, %arg3: memref<128x16xf32, #tpu.memory_space<vmem>>, %arg4: memref<16x128xf32, #tpu.memory_space<vmem>>, %arg5: memref<1x128xf32, #tpu.memory_space<vmem>>, %arg6: memref<1x128xf32, #tpu.memory_space<vmem>>, %arg7: memref<512x128xbf16, #tpu.memory_space<vmem>>, %arg8: memref<2x128xf32, #tpu.memory_space<vmem>>, %arg9: memref<40x128xf32, #tpu.memory_space<vmem>>) attributes {dimension_semantics = [], scalar_prefetch = 0 : i64, scratch_operands = 1 : i64, tpu.core_type = #tpu.core_type<tc>} {
    %c0 = arith.constant 0 : index
    %c0_0 = arith.constant 0 : index
    %0 = vector.load %arg0[%c0, %c0_0] : memref<32x128xf32, #tpu.memory_space<vmem>>, vector<32x128xf32>
    %cst = arith.constant 0.000000e+00 : f32
    %1 = vector.broadcast %cst : f32 to vector<40x128xf32>
    %c0_1 = arith.constant 0 : index
    %c0_2 = arith.constant 0 : index
    %2 = vector.load %arg9[%c0_1, %c0_2] : memref<40x128xf32, #tpu.memory_space<vmem>>, vector<40x128xf32>
    tpu.vector_store %arg9[%c0_1, %c0_2], %1 {strides = array<i32>} : memref<40x128xf32, #tpu.memory_space<vmem>>, vector<40x128xf32>,
    %3 = vector.extract_strided_slice %0 {offsets = [0, 0], sizes = [16, 128], strides = [1, 1]} : vector<32x128xf32> to vector<16x128xf32>
    %c1 = arith.constant 1 : index
    %c0_3 = arith.constant 0 : index
    %4 = vector.load %arg9[%c1, %c0_3] : memref<40x128xf32, #tpu.memory_space<vmem>>, vector<16x128xf32>
    tpu.vector_store %arg9[%c1, %c0_3], %3 {strides = array<i32>} : memref<40x128xf32, #tpu.memory_space<vmem>>, vector<16x128xf32>,
    %5 = vector.extract_strided_slice %0 {offsets = [16, 0], sizes = [16, 128], strides = [1, 1]} : vector<32x128xf32> to vector<16x128xf32>
    %c19 = arith.constant 19 : index
    %c0_4 = arith.constant 0 : index
    %6 = vector.load %arg9[%c19, %c0_4] : memref<40x128xf32, #tpu.memory_space<vmem>>, vector<16x128xf32>
    tpu.vector_store %arg9[%c19, %c0_4], %5 {strides = array<i32>} : memref<40x128xf32, #tpu.memory_space<vmem>>, vector<16x128xf32>,
    %c0_5 = arith.constant 0 : index
    %c0_6 = arith.constant 0 : index
    %7 = tpu.strided_load %arg9[%c0_5, %c0_6] {strides = array<i32: 2, 1>} : memref<40x128xf32, #tpu.memory_space<vmem>>, vector<8x128xf32>
    %c18 = arith.constant 18 : index
    %c0_7 = arith.constant 0 : index
    %8 = tpu.strided_load %arg9[%c18, %c0_7] {strides = array<i32: 2, 1>} : memref<40x128xf32, #tpu.memory_space<vmem>>, vector<8x128xf32>
    %9 = tpu.concatenate %7, %8 in 0 : vector<8x128xf32>, vector<8x128xf32> -> vector<16x128xf32>
    %c1_8 = arith.constant 1 : index
    %c0_9 = arith.constant 0 : index
    %10 = tpu.strided_load %arg9[%c1_8, %c0_9] {strides = array<i32: 2, 1>} : memref<40x128xf32, #tpu.memory_space<vmem>>, vector<8x128xf32>
    %c19_10 = arith.constant 19 : index
    %c0_11 = arith.constant 0 : index
    %11 = tpu.strided_load %arg9[%c19_10, %c0_11] {strides = array<i32: 2, 1>} : memref<40x128xf32, #tpu.memory_space<vmem>>, vector<8x128xf32>
    %12 = tpu.concatenate %10, %11 in 0 : vector<8x128xf32>, vector<8x128xf32> -> vector<16x128xf32>
    %c2 = arith.constant 2 : index
    %c0_12 = arith.constant 0 : index
    %13 = tpu.strided_load %arg9[%c2, %c0_12] {strides = array<i32: 2, 1>} : memref<40x128xf32, #tpu.memory_space<vmem>>, vector<8x128xf32>
    %c20 = arith.constant 20 : index
    %c0_13 = arith.constant 0 : index
    %14 = tpu.strided_load %arg9[%c20, %c0_13] {strides = array<i32: 2, 1>} : memref<40x128xf32, #tpu.memory_space<vmem>>, vector<8x128xf32>
    %15 = tpu.concatenate %13, %14 in 0 : vector<8x128xf32>, vector<8x128xf32> -> vector<16x128xf32>
    %c3 = arith.constant 3 : index
    %c0_14 = arith.constant 0 : index
    %16 = tpu.strided_load %arg9[%c3, %c0_14] {strides = array<i32: 2, 1>} : memref<40x128xf32, #tpu.memory_space<vmem>>, vector<8x128xf32>
    %c21 = arith.constant 21 : index
    %c0_15 = arith.constant 0 : index
    %17 = tpu.strided_load %arg9[%c21, %c0_15] {strides = array<i32: 2, 1>} : memref<40x128xf32, #tpu.memory_space<vmem>>, vector<8x128xf32>
    %18 = tpu.concatenate %16, %17 in 0 : vector<8x128xf32>, vector<8x128xf32> -> vector<16x128xf32>
    %19 = tpu.concatenate %9, %12, %15, %18 in 1 : vector<16x128xf32>, vector<16x128xf32>, vector<16x128xf32>, vector<16x128xf32> -> vector<16x512xf32>
    %20 = arith.truncf %19 : vector<16x512xf32> to vector<16x512xbf16>
    %c0_16 = arith.constant 0 : index
    %c0_17 = arith.constant 0 : index
    %21 = vector.load %arg1[%c0_16, %c0_17] : memref<512x128xbf16, #tpu.memory_space<vmem>>, vector<512x128xbf16>
    %cst_18 = arith.constant dense<0.000000e+00> : vector<16x128xf32>
    %22 = tpu.matmul %20, %21, %cst_18 {dimension_numbers = #tpu.dot_dimension_numbers<[1], [0], [0], [1], [0, 0, 1, 1], [], []>} : vector<16x512xbf16>, vector<512x128xbf16>, vector<16x128xf32> -> vector<16x128xf32>
    %cst_19 = arith.constant 2.000000e-01 : f32
    %23 = vector.broadcast %cst_19 : f32 to vector<16x128xf32>
    %24 = arith.mulf %23, %22 : vector<16x128xf32>
    %25 = arith.maximumf %22, %24 : vector<16x128xf32>
    %cst_20 = arith.constant 0.000000e+00 : f32
    %26 = vector.broadcast %cst_20 : f32 to vector<40x128xf32>
    %c0_21 = arith.constant 0 : index
    %c0_22 = arith.constant 0 : index
    %27 = vector.load %arg9[%c0_21, %c0_22] : memref<40x128xf32, #tpu.memory_space<vmem>>, vector<40x128xf32>
    tpu.vector_store %arg9[%c0_21, %c0_22], %26 {strides = array<i32>} : memref<40x128xf32, #tpu.memory_space<vmem>>, vector<40x128xf32>,
    %28 = vector.extract_strided_slice %25 {offsets = [0, 0], sizes = [8, 128], strides = [1, 1]} : vector<16x128xf32> to vector<8x128xf32>
    %c1_23 = arith.constant 1 : index
    %c0_24 = arith.constant 0 : index
    %29 = vector.load %arg9[%c1_23, %c0_24] : memref<40x128xf32, #tpu.memory_space<vmem>>, vector<8x128xf32>
    tpu.vector_store %arg9[%c1_23, %c0_24], %28 {strides = array<i32>} : memref<40x128xf32, #tpu.memory_space<vmem>>, vector<8x128xf32>,
    %30 = vector.extract_strided_slice %25 {offsets = [8, 0], sizes = [8, 128], strides = [1, 1]} : vector<16x128xf32> to vector<8x128xf32>
    %c11 = arith.constant 11 : index
    %c0_25 = arith.constant 0 : index
    %31 = vector.load %arg9[%c11, %c0_25] : memref<40x128xf32, #tpu.memory_space<vmem>>, vector<8x128xf32>
    tpu.vector_store %arg9[%c11, %c0_25], %30 {strides = array<i32>} : memref<40x128xf32, #tpu.memory_space<vmem>>, vector<8x128xf32>,
    %c0_26 = arith.constant 0 : index
    %c0_27 = arith.constant 0 : index
    %32 = tpu.strided_load %arg9[%c0_26, %c0_27] {strides = array<i32: 2, 1>} : memref<40x128xf32, #tpu.memory_space<vmem>>, vector<4x128xf32>
    %c10 = arith.constant 10 : index
    %c0_28 = arith.constant 0 : index
    %33 = tpu.strided_load %arg9[%c10, %c0_28] {strides = array<i32: 2, 1>} : memref<40x128xf32, #tpu.memory_space<vmem>>, vector<4x128xf32>
    %34 = tpu.concatenate %32, %33 in 0 : vector<4x128xf32>, vector<4x128xf32> -> vector<8x128xf32>
    %c1_29 = arith.constant 1 : index
    %c0_30 = arith.constant 0 : index
    %35 = tpu.strided_load %arg9[%c1_29, %c0_30] {strides = array<i32: 2, 1>} : memref<40x128xf32, #tpu.memory_space<vmem>>, vector<4x128xf32>
    %c11_31 = arith.constant 11 : index
    %c0_32 = arith.constant 0 : index
    %36 = tpu.strided_load %arg9[%c11_31, %c0_32] {strides = array<i32: 2, 1>} : memref<40x128xf32, #tpu.memory_space<vmem>>, vector<4x128xf32>
    %37 = tpu.concatenate %35, %36 in 0 : vector<4x128xf32>, vector<4x128xf32> -> vector<8x128xf32>
    %c2_33 = arith.constant 2 : index
    %c0_34 = arith.constant 0 : index
    %38 = tpu.strided_load %arg9[%c2_33, %c0_34] {strides = array<i32: 2, 1>} : memref<40x128xf32, #tpu.memory_space<vmem>>, vector<4x128xf32>
    %c12 = arith.constant 12 : index
    %c0_35 = arith.constant 0 : index
    %39 = tpu.strided_load %arg9[%c12, %c0_35] {strides = array<i32: 2, 1>} : memref<40x128xf32, #tpu.memory_space<vmem>>, vector<4x128xf32>
    %40 = tpu.concatenate %38, %39 in 0 : vector<4x128xf32>, vector<4x128xf32> -> vector<8x128xf32>
    %c3_36 = arith.constant 3 : index
    %c0_37 = arith.constant 0 : index
    %41 = tpu.strided_load %arg9[%c3_36, %c0_37] {strides = array<i32: 2, 1>} : memref<40x128xf32, #tpu.memory_space<vmem>>, vector<4x128xf32>
    %c13 = arith.constant 13 : index
    %c0_38 = arith.constant 0 : index
    %42 = tpu.strided_load %arg9[%c13, %c0_38] {strides = array<i32: 2, 1>} : memref<40x128xf32, #tpu.memory_space<vmem>>, vector<4x128xf32>
    %43 = tpu.concatenate %41, %42 in 0 : vector<4x128xf32>, vector<4x128xf32> -> vector<8x128xf32>
    %44 = tpu.concatenate %34, %37, %40, %43 in 1 : vector<8x128xf32>, vector<8x128xf32>, vector<8x128xf32>, vector<8x128xf32> -> vector<8x512xf32>
    %45 = arith.truncf %44 : vector<8x512xf32> to vector<8x512xbf16>
    %c0_39 = arith.constant 0 : index
    %c0_40 = arith.constant 0 : index
    %46 = vector.load %arg2[%c0_39, %c0_40] : memref<512x128xbf16, #tpu.memory_space<vmem>>, vector<512x128xbf16>
    %cst_41 = arith.constant dense<0.000000e+00> : vector<8x128xf32>
    %47 = tpu.matmul %45, %46, %cst_41 {dimension_numbers = #tpu.dot_dimension_numbers<[1], [0], [0], [1], [0, 0, 1, 1], [], []>} : vector<8x512xbf16>, vector<512x128xbf16>, vector<8x128xf32> -> vector<8x128xf32>
    %cst_42 = arith.constant dense<0.000000e+00> : vector<128xf32>
    %48 = vector.multi_reduction <add>, %47, %cst_42 [0] : vector<8x128xf32> to vector<128xf32>
    %49 = vector.shape_cast %48 : vector<128xf32> to vector<1x128xf32>
    %c0_43 = arith.constant 0 : index
    %c0_44 = arith.constant 0 : index
    %50 = vector.load %arg3[%c0_43, %c0_44] : memref<128x16xf32, #tpu.memory_space<vmem>>, vector<128x16xf32>
    %cst_45 = arith.constant dense<0.000000e+00> : vector<1x16xf32>
    %51 = tpu.matmul %49, %50, %cst_45 {dimension_numbers = #tpu.dot_dimension_numbers<[1], [0], [0], [1], [0, 0, 1, 1], [], []>} : vector<1x128xf32>, vector<128x16xf32>, vector<1x16xf32> -> vector<1x16xf32>
    %cst_46 = arith.constant 1.250000e-01 : f32
    %52 = vector.broadcast %cst_46 : f32 to vector<1x16xf32>
    %53 = arith.mulf %51, %52 : vector<1x16xf32>
    %c0_47 = arith.constant 0 : index
    %c0_48 = arith.constant 0 : index
    %54 = vector.load %arg4[%c0_47, %c0_48] : memref<16x128xf32, #tpu.memory_space<vmem>>, vector<16x128xf32>
    %cst_49 = arith.constant dense<0.000000e+00> : vector<1x128xf32>
    %55 = tpu.matmul %53, %54, %cst_49 {dimension_numbers = #tpu.dot_dimension_numbers<[1], [0], [0], [1], [0, 0, 1, 1], [], []>} : vector<1x16xf32>, vector<16x128xf32>, vector<1x128xf32> -> vector<1x128xf32>
    %56 = vector.broadcast %55 : vector<1x128xf32> to vector<8x128xf32>
    %57 = arith.subf %47, %56 : vector<8x128xf32>
    %58 = arith.mulf %57, %57 : vector<8x128xf32>
    %cst_50 = arith.constant dense<0.000000e+00> : vector<128xf32>
    %59 = vector.multi_reduction <add>, %58, %cst_50 [0] : vector<8x128xf32> to vector<128xf32>
    %60 = vector.shape_cast %59 : vector<128xf32> to vector<1x128xf32>
    %c0_51 = arith.constant 0 : index
    %c0_52 = arith.constant 0 : index
    %61 = vector.load %arg3[%c0_51, %c0_52] : memref<128x16xf32, #tpu.memory_space<vmem>>, vector<128x16xf32>
    %cst_53 = arith.constant dense<0.000000e+00> : vector<1x16xf32>
    %62 = tpu.matmul %60, %61, %cst_53 {dimension_numbers = #tpu.dot_dimension_numbers<[1], [0], [0], [1], [0, 0, 1, 1], [], []>} : vector<1x128xf32>, vector<128x16xf32>, vector<1x16xf32> -> vector<1x16xf32>
    %cst_54 = arith.constant 1.250000e-01 : f32
    %63 = vector.broadcast %cst_54 : f32 to vector<1x16xf32>
    %64 = arith.mulf %62, %63 : vector<1x16xf32>
    %c0_55 = arith.constant 0 : index
    %c0_56 = arith.constant 0 : index
    %65 = vector.load %arg4[%c0_55, %c0_56] : memref<16x128xf32, #tpu.memory_space<vmem>>, vector<16x128xf32>
    %cst_57 = arith.constant dense<0.000000e+00> : vector<1x128xf32>
    %66 = tpu.matmul %64, %65, %cst_57 {dimension_numbers = #tpu.dot_dimension_numbers<[1], [0], [0], [1], [0, 0, 1, 1], [], []>} : vector<1x16xf32>, vector<16x128xf32>, vector<1x128xf32> -> vector<1x128xf32>
    %cst_58 = arith.constant 9.99999974E-6 : f32
    %67 = vector.broadcast %cst_58 : f32 to vector<1x128xf32>
    %68 = arith.addf %66, %67 : vector<1x128xf32>
    %69 = math.rsqrt %68 : vector<1x128xf32>
    %70 = vector.broadcast %69 : vector<1x128xf32> to vector<8x128xf32>
    %71 = arith.mulf %57, %70 : vector<8x128xf32>
    %c0_59 = arith.constant 0 : index
    %c0_60 = arith.constant 0 : index
    %72 = vector.load %arg5[%c0_59, %c0_60] : memref<1x128xf32, #tpu.memory_space<vmem>>, vector<1x128xf32>
    %73 = vector.broadcast %72 : vector<1x128xf32> to vector<8x128xf32>
    %74 = arith.mulf %71, %73 : vector<8x128xf32>
    %c0_61 = arith.constant 0 : index
    %c0_62 = arith.constant 0 : index
    %75 = vector.load %arg6[%c0_61, %c0_62] : memref<1x128xf32, #tpu.memory_space<vmem>>, vector<1x128xf32>
    %76 = vector.broadcast %75 : vector<1x128xf32> to vector<8x128xf32>
    %77 = arith.addf %74, %76 : vector<8x128xf32>
    %cst_63 = arith.constant 2.000000e-01 : f32
    %78 = vector.broadcast %cst_63 : f32 to vector<8x128xf32>
    %79 = arith.mulf %78, %77 : vector<8x128xf32>
    %80 = arith.maximumf %77, %79 : vector<8x128xf32>
    %cst_64 = arith.constant 0.000000e+00 : f32
    %81 = vector.broadcast %cst_64 : f32 to vector<40x128xf32>
    %c0_65 = arith.constant 0 : index
    %c0_66 = arith.constant 0 : index
    %82 = vector.load %arg9[%c0_65, %c0_66] : memref<40x128xf32, #tpu.memory_space<vmem>>, vector<40x128xf32>
    tpu.vector_store %arg9[%c0_65, %c0_66], %81 {strides = array<i32>} : memref<40x128xf32, #tpu.memory_space<vmem>>, vector<40x128xf32>,
    %83 = vector.extract_strided_slice %80 {offsets = [0, 0], sizes = [4, 128], strides = [1, 1]} : vector<8x128xf32> to vector<4x128xf32>
    %c0_67 = arith.constant 0 : index
    %c0_68 = arith.constant 0 : index
    %84 = vector.load %arg9[%c0_67, %c0_68] : memref<40x128xf32, #tpu.memory_space<vmem>>, vector<4x128xf32>
    tpu.vector_store %arg9[%c0_67, %c0_68], %83 {strides = array<i32>} : memref<40x128xf32, #tpu.memory_space<vmem>>, vector<4x128xf32>,
    %85 = vector.extract_strided_slice %80 {offsets = [4, 0], sizes = [4, 128], strides = [1, 1]} : vector<8x128xf32> to vector<4x128xf32>
    %c4 = arith.constant 4 : index
    %c0_69 = arith.constant 0 : index
    %86 = vector.load %arg9[%c4, %c0_69] : memref<40x128xf32, #tpu.memory_space<vmem>>, vector<4x128xf32>
    tpu.vector_store %arg9[%c4, %c0_69], %85 {strides = array<i32>} : memref<40x128xf32, #tpu.memory_space<vmem>>, vector<4x128xf32>,
    %c0_70 = arith.constant 0 : index
    %c0_71 = arith.constant 0 : index
    %87 = vector.load %arg9[%c0_70, %c0_71] : memref<40x128xf32, #tpu.memory_space<vmem>>, vector<1x128xf32>
    %c4_72 = arith.constant 4 : index
    %c0_73 = arith.constant 0 : index
    %88 = vector.load %arg9[%c4_72, %c0_73] : memref<40x128xf32, #tpu.memory_space<vmem>>, vector<1x128xf32>
    %89 = tpu.concatenate %87, %88 in 0 : vector<1x128xf32>, vector<1x128xf32> -> vector<2x128xf32>
    %c1_74 = arith.constant 1 : index
    %c0_75 = arith.constant 0 : index
    %90 = vector.load %arg9[%c1_74, %c0_75] : memref<40x128xf32, #tpu.memory_space<vmem>>, vector<1x128xf32>
    %c5 = arith.constant 5 : index
    %c0_76 = arith.constant 0 : index
    %91 = vector.load %arg9[%c5, %c0_76] : memref<40x128xf32, #tpu.memory_space<vmem>>, vector<1x128xf32>
    %92 = tpu.concatenate %90, %91 in 0 : vector<1x128xf32>, vector<1x128xf32> -> vector<2x128xf32>
    %c2_77 = arith.constant 2 : index
    %c0_78 = arith.constant 0 : index
    %93 = vector.load %arg9[%c2_77, %c0_78] : memref<40x128xf32, #tpu.memory_space<vmem>>, vector<1x128xf32>
    %c6 = arith.constant 6 : index
    %c0_79 = arith.constant 0 : index
    %94 = vector.load %arg9[%c6, %c0_79] : memref<40x128xf32, #tpu.memory_space<vmem>>, vector<1x128xf32>
    %95 = tpu.concatenate %93, %94 in 0 : vector<1x128xf32>, vector<1x128xf32> -> vector<2x128xf32>
    %c3_80 = arith.constant 3 : index
    %c0_81 = arith.constant 0 : index
    %96 = vector.load %arg9[%c3_80, %c0_81] : memref<40x128xf32, #tpu.memory_space<vmem>>, vector<1x128xf32>
    %c7 = arith.constant 7 : index
    %c0_82 = arith.constant 0 : index
    %97 = vector.load %arg9[%c7, %c0_82] : memref<40x128xf32, #tpu.memory_space<vmem>>, vector<1x128xf32>
    %98 = tpu.concatenate %96, %97 in 0 : vector<1x128xf32>, vector<1x128xf32> -> vector<2x128xf32>
    %99 = tpu.concatenate %89, %92, %95, %98 in 1 : vector<2x128xf32>, vector<2x128xf32>, vector<2x128xf32>, vector<2x128xf32> -> vector<2x512xf32>
    %100 = arith.truncf %99 : vector<2x512xf32> to vector<2x512xbf16>
    %c0_83 = arith.constant 0 : index
    %c0_84 = arith.constant 0 : index
    %101 = vector.load %arg7[%c0_83, %c0_84] : memref<512x128xbf16, #tpu.memory_space<vmem>>, vector<512x128xbf16>
    %cst_85 = arith.constant dense<0.000000e+00> : vector<2x128xf32>
    %102 = tpu.matmul %100, %101, %cst_85 {dimension_numbers = #tpu.dot_dimension_numbers<[1], [0], [0], [1], [0, 0, 1, 1], [], []>} : vector<2x512xbf16>, vector<512x128xbf16>, vector<2x128xf32> -> vector<2x128xf32>
    %cst_86 = arith.constant 0.000000e+00 : f32
    %103 = vector.broadcast %cst_86 : f32 to vector<2x128xf32>
    %104 = arith.subf %103, %102 : vector<2x128xf32>
    %105 = math.exp %104 : vector<2x128xf32>
    %cst_87 = arith.constant 1.000000e+00 : f32
    %106 = vector.broadcast %cst_87 : f32 to vector<2x128xf32>
    %107 = arith.addf %106, %105 : vector<2x128xf32>
    %108 = tpu.reciprocal %107 {approx = true} : vector<2x128xf32> -> vector<2x128xf32>
    %c0_88 = arith.constant 0 : index
    %c0_89 = arith.constant 0 : index
    %109 = vector.load %arg8[%c0_88, %c0_89] : memref<2x128xf32, #tpu.memory_space<vmem>>, vector<2x128xf32>
    tpu.vector_store %arg8[%c0_88, %c0_89], %108 {strides = array<i32>} : memref<2x128xf32, #tpu.memory_space<vmem>>, vector<2x128xf32>,
    return
  }
}

</mosaic_0001>

<bundles_post_ra>
// kernel: _lambda_.1
= control target key start
LH: loop header
LB: loop body
LE: loop exit
PB: predicated region body
PF: predicated region fallthrough
CT: control target
= control target key end

     0   :  { %v2026_v1 = vmov 0.0   ;;  %vm417_vm0 = vcmask 1043456   ;;  %vm2028_vm1 = vmmov 0   ;;  %vm875_vm2 = vcmask 130048   ;;  %s2514_s1 = inlined_call_operand.vmem [shape: bf16[512,128], index: 1, kind: input, shape index: {}]   ;;  %s2515_s0 = inlined_call_operand.vmem [shape: f32[32,128], index: 0, kind: input, shape index: {}]   ;;  %s2516_s2 = inlined_call_operand.vmem [shape: bf16[512,128], index: 2, kind: input, shape index: {}]   ;;  %s2517_s3 = inlined_call_operand.vmem [shape: f32[128,16], index: 3, kind: input, shape index: {}]   ;;  %s2518_s4 = inlined_call_operand.vmem [shape: f32[16,128], index: 4, kind: input, shape index: {}]   ;;  %s2519_s7 = inlined_call_operand.vmem [shape: bf16[512,128], index: 7, kind: input, shape index: {}]   ;;  %s2520_s5 = inlined_call_operand.vmem [shape: f32[1,128], index: 5, kind: input, shape index: {}]   ;;  %s2521_s6 = inlined_call_operand.vmem [shape: f32[1,128], index: 6, kind: input, shape index: {}]   ;;  %s2522_s8 = inlined_call_operand.vmem [shape: f32[2,128], index: 8, kind: output, shape index: {}]  }
   0x1   :  { %v1924_v0 = vld [vmem:[%s2514_s1 + $0x40] sm:$0xff]   ;;  %34 = vst [vmem:[#allocation2] sm:$0xff] %v2026_v1  ;;  %35 = vst [vmem:[#allocation2 + $0x8] sm:$0xff] %v2026_v1  ;;  %v1928_v5 = vld [vmem:[%s2514_s1 + $0x48] sm:$0xff]   ;;  %vm1141_vm3 = vcmask 1040384  }
   0x2   :  { %36 = vst [vmem:[#allocation2 + $0x10] sm:$0xff] %v2026_v1  ;;  %37 = vst [vmem:[#allocation2 + $0x18] sm:$0xff] %v2026_v1  ;;  %v1925_v2 = vld [vmem:[%s2514_s1 + $0xc0] sm:$0xff]   ;;  %1611 = vmatprep.subr.bf16.mxu0 %v1924_v0  ;;  %v1929_v6 = vld [vmem:[%s2514_s1 + $0xc8] sm:$0xff]  }
   0x3   :  { %38 = vst [vmem:[#allocation2 + $0x20] sm:$0xff] %v2026_v1  ;;  %v1926_v3 = vld [vmem:[%s2514_s1] sm:$0xff]   ;;  %1633 = vmatprep.subr.bf16.mxu1 %v1925_v2  ;;  %v1930_v7 = vld [vmem:[%s2514_s1 + $0x8] sm:$0xff]   ;;  %v1932_v9 = vld [vmem:[%s2514_s1 + $0x50] sm:$0xff]  }
   0x4   :  { %v1927_v4 = vld [vmem:[%s2514_s1 + $0x80] sm:$0xff]   ;;  %1612 = vmatpush3.bf16.msra.mxu0 %v1926_v3  ;;  %v1931_v8 = vld [vmem:[%s2514_s1 + $0x88] sm:$0xff]   ;;  %v1933_v10 = vld [vmem:[%s2514_s1 + $0xd0] sm:$0xff]  }
   0x5   :  { %1634 = vmatpush3.bf16.msra.mxu1 %v1927_v4  ;;  %1613 = vmatprep.subr.bf16.mxu0 %v1928_v5  ;;  %v1934_v11 = vld [vmem:[%s2514_s1 + $0x10] sm:$0xff]   ;;  %v1936_v13 = vld [vmem:[%s2514_s1 + $0x58] sm:$0xff]   ;;  %v1940_v17 = vld [vmem:[%s2514_s1 + $0x60] sm:$0xff]  }
   0x6   :  { %1635 = vmatprep.subr.bf16.mxu1 %v1929_v6  ;;  %v1935_v12 = vld [vmem:[%s2514_s1 + $0x90] sm:$0xff]   ;;  %v1937_v14 = vld [vmem:[%s2514_s1 + $0xd8] sm:$0xff]   ;;  %v1941_v18 = vld [vmem:[%s2514_s1 + $0xe0] sm:$0xff]  }
   0x7   :  { %v1938_v15 = vld [vmem:[%s2514_s1 + $0x18] sm:$0xff]   ;;  %v1942_v19 = vld [vmem:[%s2514_s1 + $0x20] sm:$0xff]   ;;  %v1944_v21 = vld [vmem:[%s2514_s1 + $0x68] sm:$0xff]  }
   0x8   :  { %1614 = vmatpush3.bf16.msra.mxu0 %v1930_v7  ;;  %v1939_v16 = vld [vmem:[%s2514_s1 + $0x98] sm:$0xff]   ;;  %v1943_v20 = vld [vmem:[%s2514_s1 + $0xa0] sm:$0xff]   ;;  %v1945_v22 = vld [vmem:[%s2514_s1 + $0xe8] sm:$0xff]  }
   0x9   :  { %1636 = vmatpush3.bf16.msra.mxu1 %v1931_v8  ;;  %1615 = vmatprep.subr.bf16.mxu0 %v1932_v9  ;;  %v1946_v23 = vld [vmem:[%s2514_s1 + $0x28] sm:$0xff]   ;;  %v1948_v25 = vld [vmem:[%s2514_s1 + $0x70] sm:$0xff]   ;;  %v1952_v29 = vld [vmem:[%s2514_s1 + $0x78] sm:$0xff]  }
   0xa   :  { %1637 = vmatprep.subr.bf16.mxu1 %v1933_v10  ;;  %v1947_v24 = vld [vmem:[%s2514_s1 + $0xa8] sm:$0xff]   ;;  %v1949_v26 = vld [vmem:[%s2514_s1 + $0xf0] sm:$0xff]   ;;  %v1953_v30 = vld [vmem:[%s2514_s1 + $0xf8] sm:$0xff]  }
   0xb   :  { %v1950_v27 = vld [vmem:[%s2514_s1 + $0x30] sm:$0xff]   ;;  %v1954_v31 = vld [vmem:[%s2514_s1 + $0x38] sm:$0xff]   ;;  %v30_v33 = vld [vmem:[%s2515_s0] sm:$0xff] }
   0xc   :  { %1616 = vmatpush3.bf16.msra.mxu0 %v1934_v11  ;;  %v1951_v28 = vld [vmem:[%s2514_s1 + $0xb0] sm:$0xff]   ;;  %v1955_v32 = vld [vmem:[%s2514_s1 + $0xb8] sm:$0xff]   ;;  %v31_v34 = vld [vmem:[%s2515_s0 + $0x8] sm:$0xff]  ;;  %39 = vst [vmem:[#allocation2 + $0x1] sm:$0xff] %v30_v33 }
   0xd   :  { %1638 = vmatpush3.bf16.msra.mxu1 %v1935_v12  ;;  %1617 = vmatprep.subr.bf16.mxu0 %v1936_v13  ;;  %v32_v35 = vld [vmem:[%s2515_s0 + $0x10] sm:$0xff]  ;;  %v33_v36 = vld [vmem:[%s2515_s0 + $0x18] sm:$0xff]  ;;  %40 = vst [vmem:[#allocation2 + $0x9] sm:$0xff] %v31_v34  ;;  %v1956_v37 = vld [vmem:[%s2516_s2 + $0x40] sm:$0xff]  }
   0xe   :  { %1639 = vmatprep.subr.bf16.mxu1 %v1937_v14  ;;  %41 = vst [vmem:[#allocation2 + $0x13] sm:$0xff] %v32_v35  ;;  %42 = vst [vmem:[#allocation2 + $0x1b] sm:$0xff] %v33_v36  ;;  %v1957_v38 = vld [vmem:[%s2516_s2 + $0xc0] sm:$0xff]   ;;  %v1960_v52 = vld [vmem:[%s2516_s2 + $0x48] sm:$0xff]  }
   0xf   :  { %v1958_v42 = vld [vmem:[%s2516_s2] sm:$0xff]   ;;  %v1961_v54 = vld [vmem:[%s2516_s2 + $0xc8] sm:$0xff]   ;;  %v1964_v57 = vld [vmem:[%s2516_s2 + $0x50] sm:$0xff]  }
  0x10   :  { %1618 = vmatpush3.bf16.msra.mxu0 %v1938_v15  ;;  %v1959_v43 = vld [vmem:[%s2516_s2 + $0x80] sm:$0xff]   ;;  %v1962_v55 = vld [vmem:[%s2516_s2 + $0x8] sm:$0xff]   ;;  %v1965_v58 = vld [vmem:[%s2516_s2 + $0xd0] sm:$0xff]  }
  0x11   :  { %1640 = vmatpush3.bf16.msra.mxu1 %v1939_v16  ;;  %1619 = vmatprep.subr.bf16.mxu0 %v1940_v17  ;;  %v1963_v56 = vld [vmem:[%s2516_s2 + $0x88] sm:$0xff]   ;;  %v1966_v59 = vld [vmem:[%s2516_s2 + $0x10] sm:$0xff]   ;;  %v1968_v61 = vld [vmem:[%s2516_s2 + $0x58] sm:$0xff]  }
  0x12   :  { %1641 = vmatprep.subr.bf16.mxu1 %v1941_v18  ;;  %v1967_v60 = vld [vmem:[%s2516_s2 + $0x90] sm:$0xff]   ;;  %v1969_v62 = vld [vmem:[%s2516_s2 + $0xd8] sm:$0xff]   ;;  %v1972_v2 = vld [vmem:[%s2516_s2 + $0x60] sm:$0xff]   ;;  %v2027_v18 = vmov 0.0|0.0  }
  0x13   :  { %v1970_v63 = vld [vmem:[%s2516_s2 + $0x18] sm:$0xff]   ;;  %v1973_v3 = vld [vmem:[%s2516_s2 + $0xe0] sm:$0xff]   ;;  %v1976_v6 = vld [vmem:[%s2516_s2 + $0x68] sm:$0xff]  }
  0x14   :  { %1620 = vmatpush3.bf16.msra.mxu0 %v1942_v19  ;;  %v47_v39 = vld [vmem:[#allocation2 + $0x1] ss:$2 sm:$0xff]  ;;  %v43_v41 = vld [vmem:[#allocation2] ss:$2 sm:$0xff]  ;;  %v1971_v0 = vld [vmem:[%s2516_s2 + $0x98] sm:$0xff]  }
  0x15   :  { %1642 = vmatpush3.bf16.msra.mxu1 %v1943_v20  ;;  %1621 = vmatprep.subr.bf16.mxu0 %v1944_v21  ;;  %v55_v40 = vld [vmem:[#allocation2 + $0x3] ss:$2 sm:$0xff]  ;;  %v49_v44 = vld [vmem:[#allocation2 + $0x13] ss:$2 sm:$0xff]  ;;  %v45_v46 = vld [vmem:[#allocation2 + $0x12] ss:$2 sm:$0xff] }
  0x16   :  { %1643 = vmatprep.subr.bf16.mxu1 %v1945_v22  ;;  %v57_v45 = vld [vmem:[#allocation2 + $0x15] ss:$2 sm:$0xff]  ;;  %v59_v47 = vpack.c.bf16 %v49_v44, %v47_v39  ;;  %v58_v49 = vpack.c.bf16 %v45_v46, %v43_v41  ;;  %v51_v50 = vld [vmem:[#allocation2 + $0x2] ss:$2 sm:$0xff] }
  0x17   :  { %v61_v48 = vpack.c.bf16 %v57_v45, %v55_v40  ;;  %v53_v51 = vld [vmem:[#allocation2 + $0x14] ss:$2 sm:$0xff]  ;;  %404 = vst [vmem:[#allocation2] sm:$0xff] %v2026_v1  ;;  %405 = vst [vmem:[#allocation2 + $0x8] sm:$0xff] %v2026_v1  ;;  %v1977_v7 = vld [vmem:[%s2516_s2 + $0xe8] sm:$0xff]  }
  0x18   :  { %1622 = vmatpush3.bf16.msra.mxu0 %v1946_v23  ;;  %v60_v53 = vpack.c.bf16 %v53_v51, %v51_v50  ;;  %406 = vst [vmem:[#allocation2 + $0x10] sm:$0xff] %v2026_v1  ;;  %1132 = vst [vmem:[#allocation2 + $0x18] sm:$0xff] %v2026_v1  ;;  %350 = vmatprep.mubr.bf16.mxu0 %v59_v47  ;;  %v1974_v4 = vld [vmem:[%s2516_s2 + $0x20] sm:$0xff]   ;;  %v1978_v8 = vld [vmem:[%s2516_s2 + $0x28] sm:$0xff]  }
  0x19   :  { %1644 = vmatpush3.bf16.msra.mxu1 %v1947_v24  ;;  %1623 = vmatprep.subr.bf16.mxu0 %v1948_v25  ;;  %1133 = vst [vmem:[#allocation2 + $0x20] sm:$0xff] %v2026_v1  ;;  %v1975_v5 = vld [vmem:[%s2516_s2 + $0xa0] sm:$0xff]   ;;  %v1979_v9 = vld [vmem:[%s2516_s2 + $0xa8] sm:$0xff]   ;;  %v1980_v10 = vld [vmem:[%s2516_s2 + $0x70] sm:$0xff]  }
  0x1a   :  { %1645 = vmatprep.subr.bf16.mxu1 %v1949_v26  ;;  %391 = vmatprep.mubr.bf16.mxu1 %v61_v48  ;;  %v1981_v11 = vld [vmem:[%s2516_s2 + $0xf0] sm:$0xff]   ;;  %v1984_v14 = vld [vmem:[%s2516_s2 + $0x78] sm:$0xff]   ;;  %v786_v41 = vld [vmem:[%s2517_s3] sm:$0xff] }
  0x1b   :  { %v1982_v12 = vld [vmem:[%s2516_s2 + $0x30] sm:$0xff]   ;;  %v1985_v15 = vld [vmem:[%s2516_s2 + $0xf8] sm:$0xff]   ;;  %v787_v47 = vld [vmem:[%s2517_s3 + $0x8] sm:$0xff] }
  0x1c   :  { %1624 = vmatpush3.bf16.msra.mxu0 %v1950_v27  ;;  %v1983_v13 = vld [vmem:[%s2516_s2 + $0xb0] sm:$0xff]   ;;  %v1986_v16 = vld [vmem:[%s2516_s2 + $0x38] sm:$0xff]  }
  0x1d   :  { %1646 = vmatpush3.bf16.msra.mxu1 %v1951_v28  ;;  %1625 = vmatprep.subr.bf16.mxu0 %v1952_v29  ;;  %v1987_v17 = vld [vmem:[%s2516_s2 + $0xb8] sm:$0xff]  }
  0x1e   :  { %1647 = vmatprep.subr.bf16.mxu1 %v1953_v30 }
  0x20   :  { %1626 = vmatpush3.bf16.msra.mxu0 %v1954_v31 }
  0x21   :  { %1648 = vmatpush3.bf16.msra.mxu1 %v1955_v32  ;;  %1655 = vmatprep.subr.bf16.mxu0 %v1956_v37 }
  0x22   :  { %1677 = vmatprep.subr.bf16.mxu1 %v1957_v38 }
  0x23   :  { %351 = vmatmul.mubr.bf16.vlgmr.msra.gmra.mrb[0].mxu0 %v58_v49 }
  0x24   :  { %392 = vmatmul.mubr.bf16.vlgmr.msra.gmra.mrb[0].mxu1 %v60_v53  ;;  %1656 = vmatpush3.bf16.msra.mxu0 %v1958_v42 }
  0x25   :  { %1678 = vmatpush3.bf16.msra.mxu1 %v1959_v43  ;;  %1657 = vmatprep.subr.bf16.mxu0 %v1960_v52 }
  0x26   :  { %1679 = vmatprep.subr.bf16.mxu1 %v1961_v54 }
  0x28   :  { %1658 = vmatpush3.bf16.msra.mxu0 %v1962_v55 }
  0x29   :  { %1680 = vmatpush3.bf16.msra.mxu1 %v1963_v56  ;;  %1659 = vmatprep.subr.bf16.mxu0 %v1964_v57  ;;  %v2302_v56 = vpack.c.bf16 %v787_v47, %v786_v41 }
  0x2a   :  { %1681 = vmatprep.subr.bf16.mxu1 %v1965_v58 }
  0x2c   :  { %1660 = vmatpush3.bf16.msra.mxu0 %v1966_v59  ;;  %v788_v59 = vld [vmem:[%s2517_s3 + $0x10] sm:$0xff] }
  0x2d   :  { %1682 = vmatpush3.bf16.msra.mxu1 %v1967_v60  ;;  %1661 = vmatprep.subr.bf16.mxu0 %v1968_v61  ;;  %v789_v60 = vld [vmem:[%s2517_s3 + $0x18] sm:$0xff] }
  0x2e   :  { %1683 = vmatprep.subr.bf16.mxu1 %v1969_v62  ;;  %v2312_v62 = vpack.c.bf16 %v789_v60, %v788_v59  ;;  %v1990_v59 = vld [vmem:[%s2519_s7] sm:$0xff]  }
  0x2f   :  { %v1991_v60 = vld [vmem:[%s2519_s7 + $0x80] sm:$0xff]  }
  0x30   :  { %1662 = vmatpush3.bf16.msra.mxu0 %v1970_v63  ;;  %v790_v63 = vld [vmem:[%s2517_s3 + $0x20] sm:$0xff] }
  0x31   :  { %1684 = vmatpush3.bf16.msra.mxu1 %v1971_v0  ;;  %1663 = vmatprep.subr.bf16.mxu0 %v1972_v2  ;;  %v791_v0 = vld [vmem:[%s2517_s3 + $0x28] sm:$0xff] }
  0x32   :  { %1685 = vmatprep.subr.bf16.mxu1 %v1973_v3  ;;  %v2322_v2 = vpack.c.bf16 %v791_v0, %v790_v63  ;;  %v792_v3 = vld [vmem:[%s2517_s3 + $0x30] sm:$0xff]  ;;  %v1994_v63 = vld [vmem:[%s2519_s7 + $0x8] sm:$0xff]  }
  0x33   :  { %v1995_v0 = vld [vmem:[%s2519_s7 + $0x88] sm:$0xff]  }
  0x34   :  { %1664 = vmatpush3.bf16.msra.mxu0 %v1974_v4  ;;  %v793_v4 = vld [vmem:[%s2517_s3 + $0x38] sm:$0xff] }
  0x35   :  { %1686 = vmatpush3.bf16.msra.mxu1 %v1975_v5  ;;  %1665 = vmatprep.subr.bf16.mxu0 %v1976_v6  ;;  %v2332_v5 = vpack.c.bf16 %v793_v4, %v792_v3  ;;  %v794_v6 = vld [vmem:[%s2517_s3 + $0x40] sm:$0xff]  ;;  %v1997_v3 = vld [vmem:[%s2519_s7 + $0xd0] sm:$0xff]  }
  0x36   :  { %1687 = vmatprep.subr.bf16.mxu1 %v1977_v7  ;;  %v795_v7 = vld [vmem:[%s2517_s3 + $0x48] sm:$0xff]  ;;  %v1998_v4 = vld [vmem:[%s2519_s7 + $0x10] sm:$0xff]  }
  0x38   :  { %1666 = vmatpush3.bf16.msra.mxu0 %v1978_v8  ;;  %v1880_v8 = vpack.c.bf16 %v795_v7, %v794_v6  ;;  %v2000_v6 = vld [vmem:[%s2519_s7 + $0x58] sm:$0xff]  }
  0x39   :  { %1688 = vmatpush3.bf16.msra.mxu1 %v1979_v9  ;;  %1667 = vmatprep.subr.bf16.mxu0 %v1980_v10  ;;  %v796_v9 = vld [vmem:[%s2517_s3 + $0x50] sm:$0xff]  ;;  %v797_v10 = vld [vmem:[%s2517_s3 + $0x58] sm:$0xff] }
  0x3a   :  { %1689 = vmatprep.subr.bf16.mxu1 %v1981_v11  ;;  %v1883_v11 = vpack.c.bf16 %v797_v10, %v796_v9  ;;  %v2001_v7 = vld [vmem:[%s2519_s7 + $0xd8] sm:$0xff]   ;;  %v2004_v10 = vld [vmem:[%s2519_s7 + $0x60] sm:$0xff]  }
  0x3b   :  { %v2003_v9 = vld [vmem:[%s2519_s7 + $0x98] sm:$0xff]  }
  0x3c   :  { %1668 = vmatpush3.bf16.msra.mxu0 %v1982_v12  ;;  %v798_v12 = vld [vmem:[%s2517_s3 + $0x60] sm:$0xff] }
  0x3d   :  { %1690 = vmatpush3.bf16.msra.mxu1 %v1983_v13  ;;  %1669 = vmatprep.subr.bf16.mxu0 %v1984_v14  ;;  %v799_v13 = vld [vmem:[%s2517_s3 + $0x68] sm:$0xff] }
  0x3e   :  { %1691 = vmatprep.subr.bf16.mxu1 %v1985_v15  ;;  %v1886_v14 = vpack.c.bf16 %v799_v13, %v798_v12  ;;  %v800_v15 = vld [vmem:[%s2517_s3 + $0x70] sm:$0xff]  ;;  %v2006_v12 = vld [vmem:[%s2519_s7 + $0x20] sm:$0xff]  }
  0x3f   :  { %v2007_v13 = vld [vmem:[%s2519_s7 + $0xa0] sm:$0xff]  }
  0x40   :  { %1670 = vmatpush3.bf16.msra.mxu0 %v1986_v16  ;;  %v801_v16 = vld [vmem:[%s2517_s3 + $0x78] sm:$0xff] }
  0x41   :  { %1692 = vmatpush3.bf16.msra.mxu1 %v1987_v17  ;;  %1867 = vmatprep.subr.bf16.mxu0 %v2027_v18  ;;  %v1889_v17 = vpack.c.bf16 %v801_v16, %v800_v15  ;;  %v2009_v15 = vld [vmem:[%s2519_s7 + $0xe8] sm:$0xff]  }
  0x42   :  { %1891 = vmatprep.subr.bf16.mxu1 %v2027_v18  ;;  %v2010_v16 = vld [vmem:[%s2519_s7 + $0x28] sm:$0xff]  }
  0xf6   :  { %v1627_v19 = vpop.f32.mrb[0].mxu0 }
  0xf7   :  { %v1649_v20 = vpop.f32.mrb[0].mxu1  ;;  %v1628_v21 = vpop.f32.mrb[1].mxu0 }
  0xf8   :  { %v1650_v22 = vpop.f32.mrb[1].mxu1  ;;  %v1629_v23 = vadd.f32 %v1628_v21, %v1627_v19  ;;  %v1630_v25 = vpop.f32.mrb[2].mxu0  ;;  %v873_v19 = vld [vmem:[%s2518_s4] sm:$0xff] }
  0xf9   :  { %v1651_v24 = vadd.f32 %v1650_v22, %v1649_v20  ;;  %v1652_v26 = vpop.f32.mrb[2].mxu1  ;;  %v1631_v27 = vpop.f32.mrb[3].mxu0  ;;  %v874_v20 = vld [vmem:[%s2518_s4 + $0x8] sm:$0xff] }
  0xfa   :  { %v1653_v28 = vpop.f32.mrb[3].mxu1  ;;  %v1632_v30 = vadd.f32 %v1631_v27, %v1630_v25  ;;  %v1892_v21 = vpack.c.bf16 %v874_v20, %v873_v19  ;;  %v2012_v19 = vld [vmem:[%s2519_s7 + $0x70] sm:$0xff]  }
  0xfb   :  { %v394_v29 = vadd.f32 %v1651_v24, %v1629_v23  ;;  %v1654_v31 = vadd.f32 %v1653_v28, %v1652_v26  ;;  %v2013_v20 = vld [vmem:[%s2519_s7 + $0xf0] sm:$0xff]  }
  0xfd   :  { %v400_v32 = vmul.f32 0.2, %v394_v29  ;;  %v397_v33 = vadd.f32 %v1654_v31, %v1632_v30 }
  0xff   :  { %v402_v34 = vmax.f32 %v394_v29, %v400_v32  ;;  %v401_v35 = vmul.f32 0.2, %v397_v33 }
 0x101   :  { %409 = vst [vmem:[#allocation2 + $0x1] sm:$0xff] %v402_v34  ;;  %v403_v36 = vmax.f32 %v397_v33, %v401_v35 }
 0x103   :  { %410 = vst [vmem:[#allocation2 + $0xb] sm:$0xff] %v403_v36 }
 0x108   :  { %v419_v37 = vld [vmem:[#allocation2 + $0x1] ss:$2 sm:$0xf]  ;;  %v411_v39 = vld [vmem:[#allocation2] ss:$2 sm:$0xf] }
 0x109   :  { %v433_v38 = vld [vmem:[#allocation2 + $0x3] ss:$2 sm:$0xf]  ;;  %v426_v40 = vld [vmem:[#allocation2 + $0x2] ss:$2 sm:$0xf] }
 0x10a   :  { %v421_v42 = vld [vmem:[#allocation2 + $0xb] ss:$2 sm:$0xf]  ;;  %1129 = vst [vmem:[#allocation2] sm:$0xff] %v2026_v1 }
 0x10b   :  { %v435_v43 = vld [vmem:[#allocation2 + $0xd] ss:$2 sm:$0xf]  ;;  %v423_v44 = vrot.slane %v421_v42, 4 }
 0x10c   :  { %v437_v45 = vrot.slane %v435_v43, 4  ;;  %v413_v46 = vld [vmem:[#allocation2 + $0xa] ss:$2 sm:$0xf] }
 0x10d   :  { %v415_v48 = vrot.slane %v413_v46, 4  ;;  %v428_v49 = vld [vmem:[#allocation2 + $0xc] ss:$2 sm:$0xf]  ;;  %v425_v50 = vsel %vm417_vm0, %v419_v37, %v423_v44 }
 0x10e   :  { %v439_v51 = vsel %vm417_vm0, %v433_v38, %v437_v45  ;;  %v430_v52 = vrot.slane %v428_v49, 4  ;;  %1130 = vst [vmem:[#allocation2 + $0x8] sm:$0xff] %v2026_v1  ;;  %1131 = vst [vmem:[#allocation2 + $0x10] sm:$0xff] %v2026_v1  ;;  %v441_v53 = vpack.c.bf16 %v425_v50, %v425_v50 }
 0x10f   :  { %v443_v54 = vpack.c.bf16 %v439_v51, %v439_v51  ;;  %v418_v55 = vsel %vm417_vm0, %v411_v39, %v415_v48 }
 0x110   :  { %v440_v57 = vpack.c.bf16 %v418_v55, %v418_v55  ;;  %v432_v58 = vsel %vm417_vm0, %v426_v40, %v430_v52  ;;  %732 = vmatprep.mubr.bf16.mxu0 %v441_v53 }
 0x111   :  { %772 = vmatprep.mubr.bf16.mxu1 %v443_v54  ;;  %v442_v61 = vpack.c.bf16 %v432_v58, %v432_v58  ;;  %v1989_v58 = vld [vmem:[%s2519_s7 + $0xc0] sm:$0xff]  }
 0x112   :  { %733 = vmatmul.mubr.bf16.vlgmr.msra.gmra.mrb[4].mxu0 %v440_v57  ;;  %v1988_v57 = vld [vmem:[%s2519_s7 + $0x40] sm:$0xff]  }
 0x113   :  { %773 = vmatmul.mubr.bf16.vlgmr.msra.gmra.mrb[4].mxu1 %v442_v61  ;;  %1869 = vmatpush3.bf16.msra.mxu0 %v2302_v56  ;;  %v1992_v61 = vld [vmem:[%s2519_s7 + $0x48] sm:$0xff]  }
 0x114   :  { %1870 = vmatprep.subr.bf16.mxu0 %v2027_v18  ;;  %1815 = vmatprep.mubr.msk.f32.mxu0 %vm2028_vm1, %v2026_v1 }
 0x115   :  { %1822 = vmatprep.mubr.msk.f32.mxu1 %vm2028_vm1, %v2026_v1  ;;  %1893 = vmatpush3.bf16.msra.mxu1 %v1892_v21 }
 0x116   :  { %1894 = vmatprep.subr.bf16.mxu1 %v2027_v18 }
 0x117   :  { %1872 = vmatpush3.bf16.msra.mxu0 %v2312_v62 }
 0x118   :  { %1873 = vmatprep.subr.bf16.mxu0 %v2027_v18 }
 0x11b   :  { %1875 = vmatpush3.bf16.msra.mxu0 %v2322_v2 }
 0x11c   :  { %1876 = vmatprep.subr.bf16.mxu0 %v2027_v18 }
 0x11f   :  { %1878 = vmatpush3.bf16.msra.mxu0 %v2332_v5 }
 0x120   :  { %1879 = vmatprep.subr.bf16.mxu0 %v2027_v18 }
 0x123   :  { %1881 = vmatpush3.bf16.msra.mxu0 %v1880_v8 }
 0x124   :  { %1882 = vmatprep.subr.bf16.mxu0 %v2027_v18 }
 0x127   :  { %1884 = vmatpush3.bf16.msra.mxu0 %v1883_v11 }
 0x128   :  { %1885 = vmatprep.subr.bf16.mxu0 %v2027_v18 }
 0x12b   :  { %1887 = vmatpush3.bf16.msra.mxu0 %v1886_v14 }
 0x12c   :  { %1888 = vmatprep.subr.bf16.mxu0 %v2027_v18 }
 0x12f   :  { %1890 = vmatpush3.bf16.msra.mxu0 %v1889_v17 }
 0x130   :  { %1918 = vmatprep.subr.bf16.mxu0 %v2027_v18 }
 0x1e5   :  { %v1671_v22 = vpop.f32.mrb[4].mxu0 }
 0x1e6   :  { %v1693_v23 = vpop.f32.mrb[4].mxu1  ;;  %v1672_v24 = vpop.f32.mrb[5].mxu0 }
 0x1e7   :  { %v1673_v25 = vadd.f32 %v1672_v24, %v1671_v22  ;;  %v1694_v26 = vpop.f32.mrb[5].mxu1  ;;  %v1674_v27 = vpop.f32.mrb[6].mxu0  ;;  %v2015_v22 = vld [vmem:[%s2519_s7 + $0xb0] sm:$0xff]   ;;  %v2017_v24 = vld [vmem:[%s2519_s7 + $0xf8] sm:$0xff]  }
 0x1e8   :  { %v1695_v28 = vadd.f32 %v1694_v26, %v1693_v23  ;;  %v1696_v29 = vpop.f32.mrb[6].mxu1  ;;  %v1675_v30 = vpop.f32.mrb[7].mxu0  ;;  %v2016_v23 = vld [vmem:[%s2519_s7 + $0x78] sm:$0xff]  }
 0x1e9   :  { %v1697_v31 = vpop.f32.mrb[7].mxu1  ;;  %v2019_v26 = vld [vmem:[%s2519_s7 + $0xb8] sm:$0xff]  }
 0x1ea   :  { %v775_v32 = vadd.f32 %v1695_v28, %v1673_v25  ;;  %v2018_v25 = vld [vmem:[%s2519_s7 + $0x38] sm:$0xff]  }
 0x1ec   :  { %v780_v33 = vrot.slane %v775_v32, 4 }
 0x1ee   :  { %v781_v34 = vadd.f32 %v780_v33, %v775_v32 }
 0x1f0   :  { %v782_v35 = vrot.slane %v781_v34, 2 }
 0x1f2   :  { %v783_v36 = vadd.f32 %v782_v35, %v781_v34  ;;  %v1578_v34 = vld [vmem:[%s2521_s6] ss:$0 sm:$0xff] }
 0x1f4   :  { %v784_v37 = vrot.slane %v783_v36, 1 }
 0x1f6   :  { %v785_v38 = vadd.f32 %v784_v37, %v783_v36 }
 0x1f8   :  { %1816 = vmatmul.mubr.f32.vlgmr.msra.gmra.mrb[8].mxu0 %v785_v38 }
 0x1f9   :  { %1920 = vmatpush3.bf16.msra.mxu0 %v1892_v21  ;;  %1864 = vmatprep.mubr.msk.f32.mxu0 %vm2028_vm1, %v2026_v1  ;;  %v2014_v21 = vld [vmem:[%s2519_s7 + $0x30] sm:$0xff]  }
 0x1fa   :  { %1739 = vmatprep.subr.bf16.mxu0 %v1988_v57 }
 0x2cb   :  { %v868_v39 = vpop.f32.mrb[8].mxu0 }
 0x2cc   :  { %v872_v40 = vmul.f32 0.125, %v868_v39  ;;  %v1817_v41 = vpop.f32.mrb[9].mxu0 }
 0x2ce   :  { %1823 = vmatmul.mubr.msk.f32.vlgmr.msra.gmra.mrb[8].mxu1 %vm875_vm2, %v872_v40 }
 0x2cf   :  { %1896 = vmatpush3.bf16.msra.mxu1 %v2302_v56  ;;  %1857 = vmatprep.mubr.msk.f32.mxu1 %vm2028_vm1, %v2026_v1  ;;  %v949_v1 = vlaneseq }
 0x2d0   :  { %1897 = vmatprep.subr.bf16.mxu1 %v2027_v18 }
 0x2d1   :  { %v2392_v42 = vshrl.u32 %v949_v1, 7 }
 0x2d3   :  { %1899 = vmatpush3.bf16.msra.mxu1 %v2312_v62  ;;  %v951_v43 = vsub.s32 0, %v2392_v42  ;;  %v1993_v62 = vld [vmem:[%s2519_s7 + $0xc8] sm:$0xff]  }
 0x2d4   :  { %1900 = vmatprep.subr.bf16.mxu1 %v2027_v18 }
 0x2d7   :  { %1902 = vmatpush3.bf16.msra.mxu1 %v2322_v2  ;;  %v1996_v2 = vld [vmem:[%s2519_s7 + $0x50] sm:$0xff]  }
 0x2d8   :  { %1903 = vmatprep.subr.bf16.mxu1 %v2027_v18 }
 0x2db   :  { %1905 = vmatpush3.bf16.msra.mxu1 %v2332_v5  ;;  %v1999_v5 = vld [vmem:[%s2519_s7 + $0x90] sm:$0xff]  }
 0x2dc   :  { %1906 = vmatprep.subr.bf16.mxu1 %v2027_v18 }
 0x2df   :  { %1908 = vmatpush3.bf16.msra.mxu1 %v1880_v8  ;;  %v2002_v8 = vld [vmem:[%s2519_s7 + $0x18] sm:$0xff]  }
 0x2e0   :  { %1909 = vmatprep.subr.bf16.mxu1 %v2027_v18 }
 0x2e3   :  { %1911 = vmatpush3.bf16.msra.mxu1 %v1883_v11  ;;  %v2005_v11 = vld [vmem:[%s2519_s7 + $0xe0] sm:$0xff]  }
 0x2e4   :  { %1912 = vmatprep.subr.bf16.mxu1 %v2027_v18 }
 0x2e7   :  { %1914 = vmatpush3.bf16.msra.mxu1 %v1886_v14  ;;  %v2008_v14 = vld [vmem:[%s2519_s7 + $0x68] sm:$0xff]  }
 0x2e8   :  { %1915 = vmatprep.subr.bf16.mxu1 %v2027_v18 }
 0x2eb   :  { %1917 = vmatpush3.bf16.msra.mxu1 %v1889_v17  ;;  %v2011_v17 = vld [vmem:[%s2519_s7 + $0xa8] sm:$0xff]  }
 0x2ec   :  { %1761 = vmatprep.subr.bf16.mxu1 %v1989_v58 }
 0x3a1   :  { %v945_v44 = vpop.f32.mrb[8].mxu1 }
 0x3a2   :  { %v952_v45 = vrot.slane %v945_v44, %v951_v43  ;;  %v1824_v46 = vpop.f32.mrb[9].mxu1 }
 0x3a4   :  { %v2397_v47 = vsub.f32 %v775_v32, %v952_v45  ;;  %v1577_v32 = vld [vmem:[%s2520_s5] ss:$0 sm:$0xff] }
 0x3a6   :  { %v954_v48 = vmul.f32 %v2397_v47, %v2397_v47 }
 0x3a8   :  { %v955_v49 = vrot.slane %v954_v48, 4 }
 0x3aa   :  { %v956_v50 = vadd.f32 %v955_v49, %v954_v48 }
 0x3ac   :  { %v957_v51 = vrot.slane %v956_v50, 2 }
 0x3ae   :  { %v958_v18 = vadd.f32 %v957_v51, %v956_v50 }
 0x3b0   :  { %v959_v52 = vrot.slane %v958_v18, 1 }
 0x3b2   :  { %v960_v53 = vadd.f32 %v959_v52, %v958_v18 }
 0x3b4   :  { %1858 = vmatmul.mubr.f32.vlgmr.msra.gmra.mrb[10].mxu1 %v960_v53 }
 0x3b5   :  { %1762 = vmatpush3.bf16.msra.mxu1 %v1991_v60 }
 0x3b6   :  { %1763 = vmatprep.subr.bf16.mxu1 %v1993_v62 }
 0x3b9   :  { %1764 = vmatpush3.bf16.msra.mxu1 %v1995_v0 }
 0x3ba   :  { %1765 = vmatprep.subr.bf16.mxu1 %v1997_v3 }
 0x3bd   :  { %1766 = vmatpush3.bf16.msra.mxu1 %v1999_v5 }
 0x3be   :  { %1767 = vmatprep.subr.bf16.mxu1 %v2001_v7 }
 0x3c1   :  { %1768 = vmatpush3.bf16.msra.mxu1 %v2003_v9 }
 0x3c2   :  { %1769 = vmatprep.subr.bf16.mxu1 %v2005_v11 }
 0x3c5   :  { %1770 = vmatpush3.bf16.msra.mxu1 %v2007_v13 }
 0x3c6   :  { %1771 = vmatprep.subr.bf16.mxu1 %v2009_v15 }
 0x3c9   :  { %1772 = vmatpush3.bf16.msra.mxu1 %v2011_v17 }
 0x3ca   :  { %1773 = vmatprep.subr.bf16.mxu1 %v2013_v20 }
 0x3cd   :  { %1774 = vmatpush3.bf16.msra.mxu1 %v2015_v22 }
 0x3ce   :  { %1775 = vmatprep.subr.bf16.mxu1 %v2017_v24 }
 0x3d1   :  { %1776 = vmatpush3.bf16.msra.mxu1 %v2019_v26 }
 0x487   :  { %v1027_v54 = vpop.f32.mrb[10].mxu1 }
 0x488   :  { %v1031_v55 = vmul.f32 0.125, %v1027_v54  ;;  %v1859_v56 = vpop.f32.mrb[11].mxu1 }
 0x48a   :  { %1865 = vmatmul.mubr.msk.f32.vlgmr.msra.gmra.mrb[10].mxu0 %vm875_vm2, %v1031_v55 }
 0x48b   :  { %1740 = vmatpush3.bf16.msra.mxu0 %v1990_v59 }
 0x48c   :  { %1741 = vmatprep.subr.bf16.mxu0 %v1992_v61 }
 0x48f   :  { %1742 = vmatpush3.bf16.msra.mxu0 %v1994_v63 }
 0x490   :  { %1743 = vmatprep.subr.bf16.mxu0 %v1996_v2 }
 0x493   :  { %1744 = vmatpush3.bf16.msra.mxu0 %v1998_v4 }
 0x494   :  { %1745 = vmatprep.subr.bf16.mxu0 %v2000_v6 }
 0x497   :  { %1746 = vmatpush3.bf16.msra.mxu0 %v2002_v8 }
 0x498   :  { %1747 = vmatprep.subr.bf16.mxu0 %v2004_v10 }
 0x49b   :  { %1748 = vmatpush3.bf16.msra.mxu0 %v2006_v12 }
 0x49c   :  { %1749 = vmatprep.subr.bf16.mxu0 %v2008_v14 }
 0x49f   :  { %1750 = vmatpush3.bf16.msra.mxu0 %v2010_v16 }
 0x4a0   :  { %1751 = vmatprep.subr.bf16.mxu0 %v2012_v19 }
 0x4a3   :  { %1752 = vmatpush3.bf16.msra.mxu0 %v2014_v21 }
 0x4a4   :  { %1753 = vmatprep.subr.bf16.mxu0 %v2016_v23 }
 0x4a7   :  { %1754 = vmatpush3.bf16.msra.mxu0 %v2018_v25 }
 0x55d   :  { %v1101_v27 = vpop.f32.mrb[10].mxu0 }
 0x55e   :  { %v1102_v28 = vadd.f32 1e-05, %v1101_v27  ;;  %v1866_v29 = vpop.f32.mrb[11].mxu0 }
 0x560   :  { %2020 = vrsqrt.f32 %v1102_v28 }
 0x56a   :  { %v2021_v30 = vpop.eup %2020 }
 0x56b   :  { %v1109_v31 = vrot.slane %v2021_v30, %v951_v43 }
 0x56d   :  { %v1110_v33 = vmul.f32 %v1109_v31, %v2397_v47 }
 0x56f   :  { %v1118_v35 = vmul.f32 %v1577_v32, %v1110_v33 }
 0x571   :  { %v1126_v36 = vadd.f32 %v1578_v34, %v1118_v35 }
 0x573   :  { %v1127_v37 = vmul.f32 0.2, %v1126_v36 }
 0x575   :  { %v1128_v38 = vmax.f32 %v1126_v36, %v1127_v37 }
 0x577   :  { %1134 = vst [vmem:[#allocation2] sm:$0xff] %v1128_v38  }
 0x57e   :  { %v1144_v39 = vld [vmem:[#allocation2 + $0x5] sm:$0x1]  ;;  %v1156_v41 = vld [vmem:[#allocation2 + $0x7] sm:$0x1]  ;;  %v1143_v1 = vld [vmem:[#allocation2 + $0x1] sm:$0x1] }
 0x57f   :  { %v1146_v40 = vrot.slane %v1144_v39, 7  ;;  %v1158_v42 = vrot.slane %v1156_v41, 7  ;;  %v1137_v43 = vld [vmem:[#allocation2 + $0x4] sm:$0x1]  ;;  %v1155_v45 = vld [vmem:[#allocation2 + $0x3] sm:$0x1] }
 0x580   :  { %v1139_v46 = vrot.slane %v1137_v43, 7  ;;  %v1150_v47 = vld [vmem:[#allocation2 + $0x6] sm:$0x1]  ;;  %v1136_v50 = vld [vmem:[#allocation2] sm:$0x1] }
 0x581   :  { %v1148_v44 = vsel %vm1141_vm3, %v1143_v1, %v1146_v40  ;;  %v1160_v49 = vsel %vm1141_vm3, %v1155_v45, %v1158_v42  ;;  %v1152_v51 = vrot.slane %v1150_v47, 7  ;;  %v1149_v53 = vld [vmem:[#allocation2 + $0x2] sm:$0x1] }
 0x582   :  { %v1162_v48 = vpack.c.bf16 %v1148_v44, %v1148_v44  ;;  %v1164_v18 = vpack.c.bf16 %v1160_v49, %v1160_v49  ;;  %v1142_v52 = vsel %vm1141_vm3, %v1136_v50, %v1139_v46 }
 0x583   :  { %v1161_v54 = vpack.c.bf16 %v1142_v52, %v1142_v52  ;;  %v1154_v55 = vsel %vm1141_vm3, %v1149_v53, %v1152_v51 }
 0x584   :  { %1453 = vmatprep.mubr.bf16.mxu0 %v1162_v48  ;;  %1493 = vmatprep.mubr.bf16.mxu1 %v1164_v18  ;;  %v1163_v56 = vpack.c.bf16 %v1154_v55, %v1154_v55 }
 0x585   :  { %1454 = vmatmul.mubr.bf16.vlgmr.msra.gmra.mrb[12].mxu0 %v1161_v54 }
 0x586   :  { %1494 = vmatmul.mubr.bf16.vlgmr.msra.gmra.mrb[12].mxu1 %v1163_v56 }
 0x658   :  { %v1755_v57 = vpop.f32.mrb[12].mxu0 }
 0x659   :  { %v1777_v58 = vpop.f32.mrb[12].mxu1  ;;  %v1756_v59 = vpop.f32.mrb[13].mxu0 }
 0x65a   :  { %v1757_v60 = vadd.f32 %v1756_v59, %v1755_v57  ;;  %v1778_v61 = vpop.f32.mrb[13].mxu1  ;;  %v1758_v62 = vpop.f32.mrb[14].mxu0 }
 0x65b   :  { %v1779_v63 = vadd.f32 %v1778_v61, %v1777_v58  ;;  %v1780_v0 = vpop.f32.mrb[14].mxu1  ;;  %v1759_v2 = vpop.f32.mrb[15].mxu0 }
 0x65c   :  { %v1781_v3 = vpop.f32.mrb[15].mxu1 }
 0x65d   :  { %v1496_v4 = vadd.f32 %v1779_v63, %v1757_v60 }
 0x65f   :  { %v1501_v5 = vsub.f32 0.0, %v1496_v4 }
 0x661   :  { %v1502_v6 = vmul.f32 1.442695, %v1501_v5 }
 0x663   :  { %2022 = vpow2.f32 %v1502_v6 }
 0x66d   :  { %v2023_v7 = vpop.eup %2022 }
 0x66e   :  { %v1504_v8 = vadd.f32 1.0, %v2023_v7 }
 0x670   :  { %2024 = vrcp.f32 %v1504_v8 }
 0x67a   :  { %v2025_v9 = vpop.eup %2024 }
 0x67b   :  { %1506 = vst [vmem:[%s2522_s8] sm:$0x3] %v2025_v9 }

</bundles_post_ra>
